<compile_context>
chip_gen: v7x
topology: tpu7x:2x2x1
jax: 0.10.0
libtpu: 0.0.40
codegen_flags: <defaults>
</compile_context>

<pallas_src>
import functools

import jax
import jax.numpy as jnp
from jax import lax
from jax.experimental import pallas as pl
from jax.experimental.pallas import tpu as pltpu


def _sagan_kernel(xp_ref, w_ref, mask_ref, out_ref, slab_ref, *,
                  C, cq_pad, W, N):
    """Per-batch-element kernel, channels-on-sublanes / pixels-on-lanes layout.

    xp_ref   : (1, C, L)     halo-padded (H only) flattened input, L = (H+2)*W + 2
    w_ref    : (CT, 9*C)     fused conv weight, CT = 2*cq_pad + C.
                             rows [0:Cq]=Wq, [cq_pad:cq_pad+Cq]=Wk/N, [2*cq_pad:]=Wv;
                             K index = tap*C + c with tap = 3*kh + kw.
    mask_ref : (2, N)        0/1 masks killing W-boundary wraps
                             (row 0: col w-1 valid, row 1: col w+1 valid)
    out_ref  : (1, C, N)
    slab_ref : (9*C, N) f32  VMEM scratch holding the 9 shifted conv slabs
    """
    # Hoisted mask broadcasts (used 3x each below).
    m0 = jnp.broadcast_to(mask_ref[0:1, :], (C, N))
    m2 = jnp.broadcast_to(mask_ref[1:2, :], (C, N))

    # ---- build the (9*C, N) shifted/masked slab: 3 row loads, shifts in-register
    for a in range(3):                      # kernel row a reads padded rows h + a
        row = xp_ref[0, :, a * W: a * W + N + 2]          # (C, N+2), one load per a
        slab_ref[(3 * a + 0) * C:(3 * a + 1) * C, :] = row[:, 0:N] * m0       # col w-1
        slab_ref[(3 * a + 1) * C:(3 * a + 2) * C, :] = row[:, 1:N + 1]        # col w
        slab_ref[(3 * a + 2) * C:(3 * a + 3) * C, :] = row[:, 2:N + 2] * m2   # col w+1

    # ---- fused q|k|v conv: one MXU matmul, M = CT, K = 9*C, N = N --------------
    qkv = lax.dot_general(w_ref[...], slab_ref[...],
                          dimension_numbers=(((1,), (0,)), ((), ())),
                          preferred_element_type=jnp.float32)     # (CT, N)

    # 8-sublane-aligned slices; rows [Cq:cq_pad] of q/k are exact zeros.
    q = qkv[0:cq_pad, :]                                          # (cq_pad, N)
    k = qkv[cq_pad:2 * cq_pad, :]                                 # (cq_pad, N), 1/N folded
    v = qkv[2 * cq_pad:2 * cq_pad + C, :]                         # (C, N)

    # kvT[c, r] = sum_n v[c, n] * k[r, n]  == (k @ v^T / N)^T   (MXU, K = N)
    kvT = lax.dot_general(v, k,
                          dimension_numbers=(((1,), (1,)), ((), ())),
                          preferred_element_type=jnp.float32)     # (C, cq_pad)

    # attn[c, n] = sum_r kvT[c, r] * q[r, n]   (MXU, K = cq_pad; padded rows -> 0)
    attn = lax.dot_general(kvT, q,
                           dimension_numbers=(((1,), (0,)), ((), ())),
                           preferred_element_type=jnp.float32)    # (C, N)

    # Residual = center-tap (a=1, b=1) slab, already resident in scratch (== x).
    residual = slab_ref[4 * C:5 * C, :]
    out_ref[0] = (residual + attn).astype(out_ref.dtype)


def prepare_sagan_params(wq, wk, wv, H, W):
    """One-time (per parameter set) weight fusion + wrap-mask construction.

    wq/wk: (Cq, C, 3, 3), wv: (C, C, 3, 3) — torch OIHW, bias=False.
    Returns (w_fused (CT, 9*C) f32, masks (2, N) f32).
    """
    Cq, C = wq.shape[0], wq.shape[1]
    N = H * W
    cq_pad = max(8, ((Cq + 7) // 8) * 8)

    def taps(w):
        # OIHW -> (O, kh, kw, c) -> (O, 9*C); K index = (3*kh + kw)*C + c,
        # matching the slab row order built inside the kernel.
        return jnp.transpose(w, (0, 2, 3, 1)).reshape(w.shape[0], 9 * C).astype(jnp.float32)

    zpad = jnp.zeros((cq_pad - Cq, 9 * C), jnp.float32)
    w_fused = jnp.concatenate(
        [taps(wq), zpad, taps(wk) / jnp.float32(N), zpad, taps(wv)], axis=0)  # (CT, 9C)

    wpos = jnp.arange(N, dtype=jnp.int32) % W
    masks = jnp.stack([(wpos != 0), (wpos != W - 1)]).astype(jnp.float32)     # (2, N)
    return w_fused, masks


@jax.jit
def refined_self_attention_sagan(x_nchw, w_fused, masks):
    """x_nchw: (B, C, H, W) f32; (w_fused, masks) from prepare_sagan_params."""
    B, C, H, W = x_nchw.shape
    assert W >= 2, "kernel assumes W >= 2"
    N = H * W
    L = (H + 2) * W + 2
    CT = w_fused.shape[0]
    cq_pad = (CT - C) // 2

    # Halo-pad H, flatten, pad 1 element at each end of the flat axis (corners).
    xp = jnp.pad(x_nchw, ((0, 0), (0, 0), (1, 1), (0, 0)))
    xpf = jnp.pad(xp.reshape(B, C, (H + 2) * W), ((0, 0), (0, 0), (1, 1)))    # (B,C,L)

    kernel = functools.partial(_sagan_kernel, C=C, cq_pad=cq_pad, W=W, N=N)
    out_flat = pl.pallas_call(
        kernel,
        out_shape=jax.ShapeDtypeStruct((B, C, N), x_nchw.dtype),
        grid_spec=pltpu.PrefetchScalarGridSpec(
            num_scalar_prefetch=0,
            grid=(B,),
            in_specs=[
                pl.BlockSpec((1, C, L), lambda b: (b, 0, 0)),
                pl.BlockSpec((CT, 9 * C), lambda b: (0, 0)),
                pl.BlockSpec((2, N), lambda b: (0, 0)),
            ],
            out_specs=pl.BlockSpec((1, C, N), lambda b: (b, 0, 0)),
            scratch_shapes=[pltpu.VMEM((9 * C, N), jnp.float32)],
        ),
        compiler_params=pltpu.CompilerParams(dimension_semantics=("parallel",)),
    )(xpf, w_fused, masks)

    return out_flat.reshape(B, C, H, W)                                       # NCHW


def _reference(x, wq, wk, wv):
    """Pure-JAX reference matching the PyTorch forward exactly."""
    def conv(inp, w):
        return lax.conv_general_dilated(
            inp, w, window_strides=(1, 1), padding="SAME",
            dimension_numbers=("NCHW", "OIHW", "NCHW"))
    B, C, H, W = x.shape
    N = H * W
    q = conv(x, wq).reshape(B, -1, N)
    k = conv(x, wk).reshape(B, -1, N)
    v = conv(x, wv).reshape(B, C, N)
    kv = jnp.einsum("bqn,bcn->bqc", k, v)
    norm = kv / N
    attn = jnp.einsum("bqc,bqn->bcn", norm, q)                     # norm^T @ q
    return x + attn.reshape(B, C, H, W)


if __name__ == "__main__":
    key = jax.random.PRNGKey(0)
    B, C, H, W = 2, 16, 16, 16          # in_channels=16, scale=8 -> Cq=2
    scale = 8
    Cq = C // scale

    kx, kq, kk, kv_ = jax.random.split(key, 4)
    x = jax.random.normal(kx, (B, C, H, W), dtype=jnp.float32)
    # Deterministic synthetic conv weights (torch OIHW layout), bias=False.
    wq = jax.random.normal(kq, (Cq, C, 3, 3), dtype=jnp.float32) * 0.1
    wk = jax.random.normal(kk, (Cq, C, 3, 3), dtype=jnp.float32) * 0.1
    wv = jax.random.normal(kv_, (C, C, 3, 3), dtype=jnp.float32) * 0.1
    gamma = jnp.float32(0.0)  # declared by the module but unused in forward

    # Hoisted, one-time parameter preparation (weights are static across calls).
    w_fused, masks = prepare_sagan_params(wq, wk, wv, H, W)

    out = jax.block_until_ready(refined_self_attention_sagan(x, w_fused, masks))

    ref = _reference(x, wq, wk, wv)
    err = float(jnp.max(jnp.abs(out - ref)))
    assert jnp.allclose(out, ref, atol=1e-3, rtol=1e-3), f"max abs err = {err}"
    print("KERNEL_OK")
</pallas_src>

<mosaic_0001>
module attributes {stable_mosaic.version = 11 : i64} {
  func.func @_sagan_kernel(%arg0: i32, %arg1: memref<1x16x290xf32, #tpu.memory_space<vmem>>, %arg2: memref<32x144xf32, #tpu.memory_space<vmem>>, %arg3: memref<2x256xf32, #tpu.memory_space<vmem>>, %arg4: memref<1x16x256xf32, #tpu.memory_space<vmem>>, %arg5: memref<144x256xf32, #tpu.memory_space<vmem>>) attributes {dimension_semantics = [#tpu.dimension_semantics<parallel>], iteration_bounds = array<i64: 2>, scalar_prefetch = 0 : i64, scratch_operands = 1 : i64, tpu.core_type = #tpu.core_type<tc>, window_params = [{transform_indices = @transform_0, window_bounds = array<i64: 1, 16, 290>}, {pipeline_mode = #tpu.pipeline_mode<synchronous>, transform_indices = @transform_1, window_bounds = array<i64: 32, 144>}, {pipeline_mode = #tpu.pipeline_mode<synchronous>, transform_indices = @transform_2, window_bounds = array<i64: 2, 256>}, {transform_indices = @transform_3, window_bounds = array<i64: 1, 16, 256>}]} {
    %c0 = arith.constant 0 : index
    %c0_0 = arith.constant 0 : index
    %0 = vector.load %arg3[%c0, %c0_0] : memref<2x256xf32, #tpu.memory_space<vmem>>, vector<1x256xf32>
    %1 = vector.shape_cast %0 : vector<1x256xf32> to vector<1x256xf32>
    %2 = vector.broadcast %1 : vector<1x256xf32> to vector<16x256xf32>
    %c1 = arith.constant 1 : index
    %c0_1 = arith.constant 0 : index
    %3 = vector.load %arg3[%c1, %c0_1] : memref<2x256xf32, #tpu.memory_space<vmem>>, vector<1x256xf32>
    %4 = vector.shape_cast %3 : vector<1x256xf32> to vector<1x256xf32>
    %5 = vector.broadcast %4 : vector<1x256xf32> to vector<16x256xf32>
    %c0_2 = arith.constant 0 : index
    %c0_3 = arith.constant 0 : index
    %c0_4 = arith.constant 0 : index
    %6 = vector.load %arg1[%c0_2, %c0_3, %c0_4] : memref<1x16x290xf32, #tpu.memory_space<vmem>>, vector<1x16x258xf32>
    %7 = vector.shape_cast %6 : vector<1x16x258xf32> to vector<16x258xf32>
    %8 = vector.extract_strided_slice %7 {offsets = [0, 0], sizes = [16, 256], strides = [1, 1]} : vector<16x258xf32> to vector<16x256xf32>
    %9 = arith.mulf %8, %2 : vector<16x256xf32>
    %c0_5 = arith.constant 0 : index
    %c0_6 = arith.constant 0 : index
    %10 = vector.load %arg5[%c0_5, %c0_6] : memref<144x256xf32, #tpu.memory_space<vmem>>, vector<16x256xf32>
    tpu.vector_store %arg5[%c0_5, %c0_6], %9 {strides = array<i32>} : memref<144x256xf32, #tpu.memory_space<vmem>>, vector<16x256xf32>,
    %11 = vector.extract_strided_slice %7 {offsets = [0, 1], sizes = [16, 256], strides = [1, 1]} : vector<16x258xf32> to vector<16x256xf32>
    %c16 = arith.constant 16 : index
    %c0_7 = arith.constant 0 : index
    %12 = vector.load %arg5[%c16, %c0_7] : memref<144x256xf32, #tpu.memory_space<vmem>>, vector<16x256xf32>
    tpu.vector_store %arg5[%c16, %c0_7], %11 {strides = array<i32>} : memref<144x256xf32, #tpu.memory_space<vmem>>, vector<16x256xf32>,
    %13 = vector.extract_strided_slice %7 {offsets = [0, 2], sizes = [16, 256], strides = [1, 1]} : vector<16x258xf32> to vector<16x256xf32>
    %14 = arith.mulf %13, %5 : vector<16x256xf32>
    %c32 = arith.constant 32 : index
    %c0_8 = arith.constant 0 : index
    %15 = vector.load %arg5[%c32, %c0_8] : memref<144x256xf32, #tpu.memory_space<vmem>>, vector<16x256xf32>
    tpu.vector_store %arg5[%c32, %c0_8], %14 {strides = array<i32>} : memref<144x256xf32, #tpu.memory_space<vmem>>, vector<16x256xf32>,
    %c0_9 = arith.constant 0 : index
    %c0_10 = arith.constant 0 : index
    %c16_11 = arith.constant 16 : index
    %16 = vector.load %arg1[%c0_9, %c0_10, %c16_11] : memref<1x16x290xf32, #tpu.memory_space<vmem>>, vector<1x16x258xf32>
    %17 = vector.shape_cast %16 : vector<1x16x258xf32> to vector<16x258xf32>
    %18 = vector.extract_strided_slice %17 {offsets = [0, 0], sizes = [16, 256], strides = [1, 1]} : vector<16x258xf32> to vector<16x256xf32>
    %19 = arith.mulf %18, %2 : vector<16x256xf32>
    %c48 = arith.constant 48 : index
    %c0_12 = arith.constant 0 : index
    %20 = vector.load %arg5[%c48, %c0_12] : memref<144x256xf32, #tpu.memory_space<vmem>>, vector<16x256xf32>
    tpu.vector_store %arg5[%c48, %c0_12], %19 {strides = array<i32>} : memref<144x256xf32, #tpu.memory_space<vmem>>, vector<16x256xf32>,
    %21 = vector.extract_strided_slice %17 {offsets = [0, 1], sizes = [16, 256], strides = [1, 1]} : vector<16x258xf32> to vector<16x256xf32>
    %c64 = arith.constant 64 : index
    %c0_13 = arith.constant 0 : index
    %22 = vector.load %arg5[%c64, %c0_13] : memref<144x256xf32, #tpu.memory_space<vmem>>, vector<16x256xf32>
    tpu.vector_store %arg5[%c64, %c0_13], %21 {strides = array<i32>} : memref<144x256xf32, #tpu.memory_space<vmem>>, vector<16x256xf32>,
    %23 = vector.extract_strided_slice %17 {offsets = [0, 2], sizes = [16, 256], strides = [1, 1]} : vector<16x258xf32> to vector<16x256xf32>
    %24 = arith.mulf %23, %5 : vector<16x256xf32>
    %c80 = arith.constant 80 : index
    %c0_14 = arith.constant 0 : index
    %25 = vector.load %arg5[%c80, %c0_14] : memref<144x256xf32, #tpu.memory_space<vmem>>, vector<16x256xf32>
    tpu.vector_store %arg5[%c80, %c0_14], %24 {strides = array<i32>} : memref<144x256xf32, #tpu.memory_space<vmem>>, vector<16x256xf32>,
    %c0_15 = arith.constant 0 : index
    %c0_16 = arith.constant 0 : index
    %c32_17 = arith.constant 32 : index
    %26 = vector.load %arg1[%c0_15, %c0_16, %c32_17] : memref<1x16x290xf32, #tpu.memory_space<vmem>>, vector<1x16x258xf32>
    %27 = vector.shape_cast %26 : vector<1x16x258xf32> to vector<16x258xf32>
    %28 = vector.extract_strided_slice %27 {offsets = [0, 0], sizes = [16, 256], strides = [1, 1]} : vector<16x258xf32> to vector<16x256xf32>
    %29 = arith.mulf %28, %2 : vector<16x256xf32>
    %c96 = arith.constant 96 : index
    %c0_18 = arith.constant 0 : index
    %30 = vector.load %arg5[%c96, %c0_18] : memref<144x256xf32, #tpu.memory_space<vmem>>, vector<16x256xf32>
    tpu.vector_store %arg5[%c96, %c0_18], %29 {strides = array<i32>} : memref<144x256xf32, #tpu.memory_space<vmem>>, vector<16x256xf32>,
    %31 = vector.extract_strided_slice %27 {offsets = [0, 1], sizes = [16, 256], strides = [1, 1]} : vector<16x258xf32> to vector<16x256xf32>
    %c112 = arith.constant 112 : index
    %c0_19 = arith.constant 0 : index
    %32 = vector.load %arg5[%c112, %c0_19] : memref<144x256xf32, #tpu.memory_space<vmem>>, vector<16x256xf32>
    tpu.vector_store %arg5[%c112, %c0_19], %31 {strides = array<i32>} : memref<144x256xf32, #tpu.memory_space<vmem>>, vector<16x256xf32>,
    %33 = vector.extract_strided_slice %27 {offsets = [0, 2], sizes = [16, 256], strides = [1, 1]} : vector<16x258xf32> to vector<16x256xf32>
    %34 = arith.mulf %33, %5 : vector<16x256xf32>
    %c128 = arith.constant 128 : index
    %c0_20 = arith.constant 0 : index
    %35 = vector.load %arg5[%c128, %c0_20] : memref<144x256xf32, #tpu.memory_space<vmem>>, vector<16x256xf32>
    tpu.vector_store %arg5[%c128, %c0_20], %34 {strides = array<i32>} : memref<144x256xf32, #tpu.memory_space<vmem>>, vector<16x256xf32>,
    %c0_21 = arith.constant 0 : index
    %c0_22 = arith.constant 0 : index
    %36 = vector.load %arg2[%c0_21, %c0_22] : memref<32x144xf32, #tpu.memory_space<vmem>>, vector<32x144xf32>
    %c0_23 = arith.constant 0 : index
    %c0_24 = arith.constant 0 : index
    %37 = vector.load %arg5[%c0_23, %c0_24] : memref<144x256xf32, #tpu.memory_space<vmem>>, vector<144x256xf32>
    %cst = arith.constant dense<0.000000e+00> : vector<32x256xf32>
    %38 = tpu.matmul %36, %37, %cst {dimension_numbers = #tpu.dot_dimension_numbers<[1], [0], [0], [1], [0, 0, 1, 1], [], []>} : vector<32x144xf32>, vector<144x256xf32>, vector<32x256xf32> -> vector<32x256xf32>
    %39 = vector.extract_strided_slice %38 {offsets = [0, 0], sizes = [8, 256], strides = [1, 1]} : vector<32x256xf32> to vector<8x256xf32>
    %40 = vector.extract_strided_slice %38 {offsets = [8, 0], sizes = [8, 256], strides = [1, 1]} : vector<32x256xf32> to vector<8x256xf32>
    %41 = vector.extract_strided_slice %38 {offsets = [16, 0], sizes = [16, 256], strides = [1, 1]} : vector<32x256xf32> to vector<16x256xf32>
    %cst_25 = arith.constant dense<0.000000e+00> : vector<16x8xf32>
    %42 = tpu.matmul %41, %40, %cst_25 {dimension_numbers = #tpu.dot_dimension_numbers<[1], [1], [0], [0], [0, 0, 1, 0], [], []>} : vector<16x256xf32>, vector<8x256xf32>, vector<16x8xf32> -> vector<16x8xf32>
    %cst_26 = arith.constant dense<0.000000e+00> : vector<16x256xf32>
    %43 = tpu.matmul %42, %39, %cst_26 {dimension_numbers = #tpu.dot_dimension_numbers<[1], [0], [0], [1], [0, 0, 1, 1], [], []>} : vector<16x8xf32>, vector<8x256xf32>, vector<16x256xf32> -> vector<16x256xf32>
    %c64_27 = arith.constant 64 : index
    %c0_28 = arith.constant 0 : index
    %44 = vector.load %arg5[%c64_27, %c0_28] : memref<144x256xf32, #tpu.memory_space<vmem>>, vector<16x256xf32>
    %45 = arith.addf %44, %43 : vector<16x256xf32>
    %c0_29 = arith.constant 0 : index
    %c0_30 = arith.constant 0 : index
    %c0_31 = arith.constant 0 : index
    %46 = vector.load %arg4[%c0_29, %c0_30, %c0_31] : memref<1x16x256xf32, #tpu.memory_space<vmem>>, vector<1x16x256xf32>
    %47 = vector.shape_cast %46 : vector<1x16x256xf32> to vector<16x256xf32>
    %48 = vector.shape_cast %45 : vector<16x256xf32> to vector<1x16x256xf32>
    tpu.vector_store %arg4[%c0_29, %c0_30, %c0_31], %48 {strides = array<i32>} : memref<1x16x256xf32, #tpu.memory_space<vmem>>, vector<1x16x256xf32>,
    return
  }
  func.func @transform_0(%arg0: i32) -> (i32, i32, i32) {
    %c0_i32 = arith.constant 0 : i32
    %c0_i32_0 = arith.constant 0 : i32
    %c0_i32_1 = arith.constant 0 : i32
    return %arg0, %c0_i32, %c0_i32_0 : i32, i32, i32
  }
  func.func @transform_1(%arg0: i32) -> (i32, i32) {
    %c0_i32 = arith.constant 0 : i32
    %c0_i32_0 = arith.constant 0 : i32
    %c0_i32_1 = arith.constant 0 : i32
    return %c0_i32, %c0_i32_0 : i32, i32
  }
  func.func @transform_2(%arg0: i32) -> (i32, i32) {
    %c0_i32 = arith.constant 0 : i32
    %c0_i32_0 = arith.constant 0 : i32
    %c0_i32_1 = arith.constant 0 : i32
    return %c0_i32, %c0_i32_0 : i32, i32
  }
  func.func @transform_3(%arg0: i32) -> (i32, i32, i32) {
    %c0_i32 = arith.constant 0 : i32
    %c0_i32_0 = arith.constant 0 : i32
    %c0_i32_1 = arith.constant 0 : i32
    return %arg0, %c0_i32, %c0_i32_0 : i32, i32, i32
  }
}

</mosaic_0001>

<bundles_post_ra>
// kernel: refined_self_attention_sagan.1
= control target key start
LH: loop header
LB: loop body
LE: loop exit
PB: predicated region body
PF: predicated region fallthrough
CT: control target
= control target key end

     0   :  { %s1138_s12 = smov 0   ;;  %s1324_s0 = inlined_call_operand.vmem [shape: f32[2,16,290], index: 0, kind: input, shape index: {}]   ;;  %s1325_s1 = inlined_call_operand.vmem [shape: f32[32,144], index: 1, kind: input, shape index: {}]   ;;  %s1326_s2 = inlined_call_operand.vmem [shape: f32[2,256], index: 2, kind: input, shape index: {}]   ;;  %s1327_s3 = inlined_call_operand.vmem [shape: f32[2,16,256], index: 3, kind: output, shape index: {}]  }
   0x1 LB: > { %s914_s13 = sadd.s32 4294967295, %s1102_s12   ;;  %p918_p0 = scmp.ge.s32.totalorder %s1102_s12, 1  ;;  %s1102_s12 = sphi %s1138_s12, %s13_s12  }
   0x2   : > { %p137_p1 = scmp.lt.s32.totalorder %s1102_s12, 3 }
   0x4   : > { %p138_p2 = pnand %p918_p0, %p137_p1 }
   0x5   : > { %v173_v0 = vlaneseq (!%p138_p2)  ;;  %v922_v2 = vld [vmem:[%s1326_s2 + $0x1] ss:$2 sm:$0x3] (!%p138_p2)  ;;  %v171_v3 = vld [vmem:[%s1326_s2] ss:$2 sm:$0x3] (!%p138_p2) }
   0x6   : > { %141 = sbr.rel (%p138_p2) target bundleno = 946 (0x3b2), region = 32  ;;  %p161_p3 = scmp.lt.s32.totalorder (!%p138_p2), %s914_s13, 1  ;;  %vm243_vm0 = vcmask (!%p138_p2), 15360   ;;  %vm295_vm1 = vcmask (!%p138_p2), 130048   ;;  %vm372_vm2 = vcmask (!%p138_p2), 146432   ;;  %vm424_vm3 = vcmask (!%p138_p2), 261120  }
   0x7   : > { %v174_v1 = vshrl.u32 (!%p138_p2), %v173_v0, 7  ;;  %s1104_s18 = smov (!%p138_p2), 2   ;;  %s1105_s19 = smov (!%p138_p2), 16   ;;  %vm501_vm4 = vcmask (!%p138_p2), 277504   ;;  %vm226_vm5 = vcmask (!%p138_p2), 1039360   ;;  %vm272_vm6 = vcmask (!%p138_p2), 1031168  }
   0x8   : > { %s1106_s21 = smov (!%p138_p2), 18   ;;  %s1107_s25 = smov (!%p138_p2), 32   ;;  %vm355_vm7 = vcmask (!%p138_p2), 908288   ;;  %vm324_vm8 = vcmask (!%p138_p2), 916480   ;;  %vm401_vm9 = vcmask (!%p138_p2), 900096   ;;  %vm453_vm10 = vcmask (!%p138_p2), 785408  }
   0x9   : > { %v175_v4 = vsub.s32 (!%p138_p2), 0, %v174_v1  ;;  %v179_v5 = vsub.s32 (!%p138_p2), 1, %v174_v1  ;;  %s1108_s26 = smov (!%p138_p2), 34   ;;  %s1109_s27 = smov (!%p138_p2), 127   ;;  %vm484_vm11 = vcmask (!%p138_p2), 777216   ;;  %vm530_vm12 = vcmask (!%p138_p2), 769024  }
   0xa   : > { %s1110_s28 = smov (!%p138_p2), 111   ;;  %s1111_s29 = smov (!%p138_p2), 126   ;;  %vm763_vm13 = vcmask (!%p138_p2), 64512  }
   0xb   : > { %v189_v6 = vrot.slane (!%p138_p2), %v922_v2, %v175_v4  ;;  %v176_v7 = vrot.slane (!%p138_p2), %v171_v3, %v175_v4  ;;  %v193_v8 = vrot.slane (!%p138_p2), %v922_v2, %v179_v5  ;;  %v180_v9 = vrot.slane (!%p138_p2), %v171_v3, %v179_v5  ;;  %s1112_s30 = smov (!%p138_p2), 112   ;;  %s1113_s4 = smov (!%p138_p2), 110  }
   0xc   : > { %s1114_s5 = smov (!%p138_p2), 96   ;;  %s1115_s6 = smov (!%p138_p2), 95  }
   0xd   : > { %239 = vrot.lane.b32.xlu0 %v189_v6, %s1104_s18  ;;  %291 = vrot.lane.b32.xlu1 %v176_v7, %s1105_s19  ;;  %s1329_s13 = smov (!%p161_p3, %s914_s13), 1  ;;  %s1116_s7 = smov 94  }
   0xe   : > { %s968_s20 = smul.u32 48, %s1329_s13 }
  0x10   : > { %s165_s24 = scalar_lea.vmem %s1324_s0, %s968_s20 }
  0x11   : > { %241 = vrot.lane.b32.xlu0 %v193_v8, %s1104_s18  ;;  %293 = vrot.lane.b32.xlu1 %v180_v9, %s1105_s19  ;;  %v1158_v10 = vld [vmem:[%s165_s24 + $0x8] sm:$0xff]  ;;  %v1160_v11 = vld [vmem:[%s165_s24 + $0x10] sm:$0xff] }
  0x12   : > { %v1162_v12 = vld [vmem:[%s165_s24 + $0x20] sm:$0xff]  ;;  %v1164_v13 = vld [vmem:[%s165_s24 + $0x28] sm:$0xff]  ;;  %v1168_v14 = vpack.i.bf16 %v1160_v11, %v1158_v10  ;;  %v1176_v17 = vld [vmem:[%s165_s24 + $0x18] sm:$0xff]  ;;  %v201_v19 = vmul.f32 %v1158_v10, %v180_v9 }
  0x13   : > { %v1172_v15 = vpack.i.bf16 %v1164_v13, %v1162_v12  ;;  %v1174_v16 = vld [vmem:[%s165_s24] sm:$0xff]  ;;  %v203_v20 = vmul.f32 %v1162_v12, %v180_v9  ;;  %v202_v22 = vmul.f32 %v1176_v17, %v176_v7 }
  0x14   : > { %v1182_v18 = vpack.i.bf16 %v1176_v17, %v1174_v16  ;;  %v200_v21 = vmul.f32 %v1174_v16, %v176_v7 }
  0x15   : > { %368 = vrot.lane.b32.xlu0 %v189_v6, %s1106_s21  ;;  %370 = vrot.lane.b32.xlu1 %v193_v8, %s1106_s21  ;;  %v932_v23 = vpack.c.bf16 %v203_v20, %v201_v19 }
  0x16   : > { %v934_v24 = vpack.c.bf16 %v202_v22, %v200_v21 }
  0x17   : > { %933 = vmatprep.subr.bf16.mxu0 %v932_v23 }
  0x18   : > { %935 = vmatpush1.bf16.msra.mxu0 %v934_v24 }
  0x19   : > { %420 = vrot.lane.b32.xlu0 %v176_v7, %s1107_s25  ;;  %422 = vrot.lane.b32.xlu1 %v180_v9, %s1107_s25 }
  0x1d   : > { %497 = vrot.lane.b32.xlu0 %v189_v6, %s1108_s26  ;;  %499 = vrot.lane.b32.xlu1 %v193_v8, %s1108_s26  ;;  %s931_s26 = sshll.u32 %s1329_s13, 5 }
  0x21   : > { %992 = vrot.lane.b32.xlu0 %v1168_v14, %s1109_s27  ;;  %997 = vrot.lane.b32.xlu1 %v1172_v15, %s1109_s27 }
  0x25   : > { %1002 = vrot.lane.b32.xlu0 %v1182_v18, %s1109_s27  ;;  %345 = vrot.lane.b32.xlu1 %v1158_v10, %s1110_s28 }
  0x29   : > { %347 = vrot.lane.b32.xlu0 %v1160_v11, %s1110_s28  ;;  %351 = vrot.lane.b32.xlu1 %v1162_v12, %s1110_s28 }
  0x2d   : > { %353 = vrot.lane.b32.xlu0 %v1164_v13, %s1110_s28  ;;  %343 = vrot.lane.b32.xlu1 %v1174_v16, %s1110_s28 }
  0x31   : > { %349 = vrot.lane.b32.xlu0 %v1176_v17, %s1110_s28 }
  0x7f   : > { %v240_v25 = vpop.permute.xlu0 %239  ;;  %v292_v26 = vpop.permute.xlu1 %291 }
  0x80   : > { %v248_v27 = vmul.f32 %v240_v25, %v1174_v16  ;;  %v251_v28 = vmul.f32 %v240_v25, %v1176_v17  ;;  %v300_v29 = vmul.f32 %v292_v26, %v1174_v16  ;;  %v303_v30 = vmul.f32 %v292_v26, %v1176_v17 }
  0x82   : > { %v1006_v31 = vpack.i.bf16 %v251_v28, %v248_v27  ;;  %v1011_v32 = vpack.i.bf16 %v303_v30, %v300_v29 }
  0x83   : > { %v242_v33 = vpop.permute.xlu0 %241  ;;  %v294_v34 = vpop.permute.xlu1 %293 }
  0x84   : > { %v244_v35 = vsel %vm243_vm0, %v240_v25, %v242_v33  ;;  %v253_v36 = vmul.f32 %v242_v33, %v1164_v13  ;;  %v296_v37 = vsel %vm295_vm1, %v292_v26, %v294_v34  ;;  %1007 = vrot.lane.b32.xlu1 %v1006_v31, %s1111_s29  ;;  %1012 = vrot.lane.b32.xlu0 %v1011_v32, %s1112_s30 }
  0x85   : > { %v252_v38 = vmul.f32 %v244_v35, %v1162_v12  ;;  %v301_v39 = vmul.f32 %v296_v37, %v1158_v10  ;;  %v302_v40 = vmul.f32 %v294_v34, %v1160_v11  ;;  %v249_v46 = vmul.f32 %v244_v35, %v1158_v10 }
  0x86   : > { %v250_v47 = vmul.f32 %v242_v33, %v1160_v11  ;;  %v304_v55 = vmul.f32 %v296_v37, %v1162_v12  ;;  %v305_v56 = vmul.f32 %v294_v34, %v1164_v13 }
  0x87   : > { %v369_v41 = vpop.permute.xlu0 %368  ;;  %v371_v42 = vpop.permute.xlu1 %370  ;;  %v1026_v43 = vpack.i.bf16 %v253_v36, %v252_v38  ;;  %v1031_v50 = vpack.i.bf16 %v302_v40, %v301_v39  ;;  %v544_v39 = vld [vmem:[%s1325_s1 + $0x8] sm:$0xff] }
  0x88   : > { %v377_v44 = vmul.f32 %v369_v41, %v1174_v16  ;;  %v380_v45 = vmul.f32 %v369_v41, %v1176_v17  ;;  %v373_v52 = vsel %vm372_vm2, %v369_v41, %v371_v42  ;;  %v1021_v57 = vpack.i.bf16 %v250_v47, %v249_v46  ;;  %923 = vmatprep.mubr.msk.f32.mxu0 %vm295_vm1, %v544_v39 }
  0x89   : > { %1027 = vrot.lane.b32.xlu0 %v1026_v43, %s1111_s29  ;;  %v381_v59 = vmul.f32 %v373_v52, %v1162_v12  ;;  %v382_v60 = vmul.f32 %v371_v42, %v1164_v13  ;;  %v1041_v0 = vpack.i.bf16 %v305_v56, %v304_v55  ;;  %v378_v19 = vmul.f32 %v373_v52, %v1158_v10 }
  0x8a   : > { %v1016_v48 = vpack.i.bf16 %v380_v45, %v377_v44  ;;  %v379_v20 = vmul.f32 %v371_v42, %v1160_v11 }
  0x8b   : > { %v421_v49 = vpop.permute.xlu0 %420  ;;  %v423_v51 = vpop.permute.xlu1 %422  ;;  %v1056_v3 = vpack.i.bf16 %v382_v60, %v381_v59 }
  0x8c   : > { %v429_v53 = vmul.f32 %v421_v49, %v1174_v16  ;;  %v432_v54 = vmul.f32 %v421_v49, %v1176_v17  ;;  %1017 = vrot.lane.b32.xlu1 %v1016_v48, %s1113_s4  ;;  %v425_v63 = vsel %vm424_vm3, %v421_v49, %v423_v51  ;;  %v431_v2 = vmul.f32 %v423_v51, %v1160_v11 }
  0x8d   : > { %1032 = vrot.lane.b32.xlu0 %v1031_v50, %s1112_s30  ;;  %v430_v1 = vmul.f32 %v425_v63, %v1158_v10  ;;  %v1051_v31 = vpack.i.bf16 %v379_v20, %v378_v19  ;;  %v433_v32 = vmul.f32 %v425_v63, %v1162_v12  ;;  %v434_v33 = vmul.f32 %v423_v51, %v1164_v13 }
  0x8e   : > { %v1036_v58 = vpack.i.bf16 %v432_v54, %v429_v53 }
  0x8f   : > { %v498_v61 = vpop.permute.xlu0 %497  ;;  %v500_v62 = vpop.permute.xlu1 %499  ;;  %v1061_v24 = vpack.i.bf16 %v431_v2, %v430_v1 }
  0x90   : > { %1022 = vrot.lane.b32.xlu1 %v1021_v57, %s1111_s29  ;;  %v502_v21 = vsel %vm501_vm4, %v498_v61, %v500_v62  ;;  %v508_v30 = vmul.f32 %v500_v62, %v1160_v11  ;;  %v509_v37 = vmul.f32 %v498_v61, %v1176_v17  ;;  %v1071_v11 = vpack.i.bf16 %v434_v33, %v433_v32  ;;  %s170_s29 = scalar_lea.vmem %s1327_s3, %s931_s26 }
  0x91   : > { %1037 = vrot.lane.b32.xlu0 %v1036_v58, %s1114_s5  ;;  %v507_v29 = vmul.f32 %v502_v21, %v1158_v10  ;;  %v510_v40 = vmul.f32 %v502_v21, %v1162_v12 }
  0x93   : > { %v993_v4 = vpop.permute.xlu0 %992  ;;  %v998_v5 = vpop.permute.xlu1 %997  ;;  %v1081_v10 = vpack.i.bf16 %v508_v30, %v507_v29 }
  0x94   : > { %1042 = vrot.lane.b32.xlu1 %v1041_v0, %s1112_s30  ;;  %v995_v6 = vunpack.i.h.bf16 %v993_v4  ;;  %v994_v7 = vunpack.i.l.bf16 %v993_v4  ;;  %v1000_v8 = vunpack.i.h.bf16 %v998_v5  ;;  %v999_v9 = vunpack.i.l.bf16 %v998_v5 }
  0x95   : > { %1057 = vrot.lane.b32.xlu0 %v1056_v3, %s1113_s4 }
  0x96   : > { %v228_v22 = vsel %vm226_vm5, %v994_v7, %v995_v6  ;;  %v230_v23 = vsel %vm226_vm5, %v999_v9, %v1000_v8 }
  0x97   : > { %v1003_v25 = vpop.permute.xlu0 %1002  ;;  %v936_v26 = vpack.c.bf16 %v230_v23, %v228_v22  ;;  %v346_v41 = vpop.permute.xlu1 %345 }
  0x98   : > { %1047 = vrot.lane.b32.xlu1 %v1168_v14, %s1115_s6  ;;  %v1005_v27 = vunpack.i.h.bf16 %v1003_v25  ;;  %v1004_v28 = vunpack.i.l.bf16 %v1003_v25  ;;  %v506_v14 = vmul.f32 %v498_v61, %v1174_v16  ;;  %v511_v16 = vmul.f32 %v500_v62, %v1164_v13 }
  0x99   : > { %1062 = vrot.lane.b32.xlu0 %v1061_v24, %s1114_s5  ;;  %937 = vmatprep.subr.bf16.mxu0 %v936_v26 }
  0x9a   : > { %v227_v34 = vsel %vm226_vm5, %v1004_v28, %v994_v7  ;;  %v229_v35 = vsel %vm226_vm5, %v1005_v27, %v999_v9  ;;  %v1091_v38 = vpack.i.bf16 %v509_v37, %v506_v14 }
  0x9b   : > { %v938_v36 = vpack.c.bf16 %v229_v35, %v227_v34  ;;  %v348_v17 = vpop.permute.xlu0 %347  ;;  %v352_v43 = vpop.permute.xlu1 %351 }
  0x9c   : > { %1052 = vrot.lane.b32.xlu1 %v1051_v31, %s1113_s4  ;;  %v1254_v6 = vsel %vm355_vm7, %v346_v41, %v348_v17 }
  0x9d   : > { %1067 = vrot.lane.b32.xlu0 %v1172_v15, %s1115_s6  ;;  %939 = vmatpush1.bf16.msra.mxu0 %v938_v36  ;;  %v1086_v15 = vpack.i.bf16 %v511_v16, %v510_v40 }
  0x9f   : > { %v354_v42 = vpop.permute.xlu0 %353  ;;  %v344_v45 = vpop.permute.xlu1 %343 }
  0xa0   : > { %1072 = vrot.lane.b32.xlu1 %v1071_v11, %s1114_s5  ;;  %v1257_v7 = vsel %vm355_vm7, %v352_v43, %v354_v42  ;;  %v1262_v24 = vsel %vm355_vm7, %v344_v45, %v346_v41 }
  0xa1   : > { %1082 = vrot.lane.b32.xlu0 %v1081_v10, %s1116_s7  ;;  %v948_v26 = vpack.c.bf16 %v1257_v7, %v1254_v6 }
  0xa3   : > { %v350_v44 = vpop.permute.xlu0 %349 }
  0xa4   : > { %1077 = vrot.lane.b32.xlu1 %v1182_v18, %s1115_s6  ;;  %v1267_v27 = vsel %vm355_vm7, %v350_v44, %v352_v43 }
  0xa5   : > { %1092 = vrot.lane.b32.xlu0 %v1091_v38, %s1116_s7  ;;  %v950_v32 = vpack.c.bf16 %v1267_v27, %v1262_v24 }
  0xa8   : > { %1087 = vrot.lane.b32.xlu1 %v1086_v15, %s1116_s7 }
  0xf6   : > { %v1013_v46 = vpop.permute.xlu0 %1012  ;;  %v1008_v47 = vpop.permute.xlu1 %1007 }
  0xf7   : > { %v1010_v51 = vunpack.i.h.bf16 %v1008_v47  ;;  %v1009_v52 = vunpack.i.l.bf16 %v1008_v47  ;;  %v1015_v1 = vunpack.i.h.bf16 %v1013_v46  ;;  %v1014_v2 = vunpack.i.l.bf16 %v1013_v46 }
  0xfb   : > { %v1028_v48 = vpop.permute.xlu0 %1027 }
  0xfc   : > { %v1030_v13 = vunpack.i.h.bf16 %v1028_v48  ;;  %v1029_v50 = vunpack.i.l.bf16 %v1028_v48 }
  0xfe   : > { %v1249_v49 = vpop.permute.xlu1 %1017  ;;  %v276_v56 = vsel %vm272_vm6, %v1029_v50, %v1030_v13  ;;  %v275_v57 = vsel %vm272_vm6, %v1010_v51, %v1029_v50 }
  0xff   : > { %v1033_v12 = vpop.permute.xlu0 %1032  ;;  %v1020_v30 = vunpack.i.h.bf16 %v1249_v49  ;;  %v1019_v33 = vunpack.i.l.bf16 %v1249_v49 }
 0x100   : > { %v1035_v58 = vunpack.i.h.bf16 %v1033_v12  ;;  %v1034_v59 = vunpack.i.l.bf16 %v1033_v12 }
 0x102   : > { %v1023_v18 = vpop.permute.xlu1 %1022  ;;  %v326_v8 = vsel %vm324_vm8, %v1034_v59, %v1035_v58  ;;  %v325_v19 = vsel %vm324_vm8, %v1014_v2, %v1034_v59 }
 0x103   : > { %v1025_v53 = vunpack.i.h.bf16 %v1023_v18  ;;  %v1024_v54 = vunpack.i.l.bf16 %v1023_v18  ;;  %v1251_v55 = vpop.permute.xlu0 %1037 }
 0x104   : > { %v1040_v15 = vunpack.i.h.bf16 %v1251_v55  ;;  %v1039_v17 = vunpack.i.l.bf16 %v1251_v55 }
 0x105   : > { %v274_v60 = vsel %vm272_vm6, %v1024_v54, %v1025_v53  ;;  %v273_v61 = vsel %vm272_vm6, %v1009_v52, %v1024_v54 }
 0x106   : > { %v1043_v62 = vpop.permute.xlu1 %1042  ;;  %v940_v63 = vpack.c.bf16 %v276_v56, %v274_v60  ;;  %v942_v0 = vpack.c.bf16 %v275_v57, %v273_v61 }
 0x107   : > { %v1045_v3 = vunpack.i.h.bf16 %v1043_v62  ;;  %v1044_v4 = vunpack.i.l.bf16 %v1043_v62  ;;  %v1058_v5 = vpop.permute.xlu0 %1057 }
 0x108   : > { %941 = vmatprep.subr.bf16.mxu0 %v940_v63  ;;  %v1060_v28 = vunpack.i.h.bf16 %v1058_v5  ;;  %v1059_v29 = vunpack.i.l.bf16 %v1058_v5 }
 0x109   : > { %943 = vmatpush1.bf16.msra.mxu0 %v942_v0  ;;  %v328_v9 = vsel %vm324_vm8, %v1044_v4, %v1045_v3  ;;  %v327_v20 = vsel %vm324_vm8, %v1015_v1, %v1044_v4 }
 0x10a   : > { %v1259_v21 = vpop.permute.xlu1 %1047  ;;  %v944_v22 = vpack.c.bf16 %v328_v9, %v326_v8  ;;  %v946_v23 = vpack.c.bf16 %v327_v20, %v325_v19  ;;  %v405_v10 = vsel %vm401_vm9, %v1059_v29, %v1060_v28  ;;  %v404_v11 = vsel %vm401_vm9, %v1020_v30, %v1059_v29  ;;  %v547_v28 = vld [vmem:[%s1325_s1 + $0x20] sm:$0xff]  ;;  %v550_v29 = vld [vmem:[%s1325_s1 + $0x38] sm:$0xff]  ;;  %v549_v30 = vld [vmem:[%s1325_s1 + $0x30] sm:$0xff] }
 0x10b   : > { %v1063_v25 = vpop.permute.xlu0 %1062  ;;  %v1050_v44 = vunpack.i.h.bf16 %v1259_v21  ;;  %v1049_v45 = vunpack.i.l.bf16 %v1259_v21 }
 0x10c   : > { %945 = vmatprep.subr.bf16.mxu0 %v944_v22  ;;  %v1065_v14 = vunpack.i.h.bf16 %v1063_v25  ;;  %v1064_v37 = vunpack.i.l.bf16 %v1063_v25  ;;  %v543_v22 = vld [vmem:[%s1325_s1] sm:$0xff]  ;;  %v545_v25 = vld [vmem:[%s1325_s1 + $0x10] sm:$0xff] }
 0x10d   : > { %947 = vmatpush1.bf16.msra.mxu0 %v946_v23  ;;  %v486_v57 = vsel %vm484_vm11, %v1049_v45, %v1050_v44  ;;  %v546_v23 = vld [vmem:[%s1325_s1 + $0x18] sm:$0xff] }
 0x10e   : > { %v1053_v31 = vpop.permute.xlu1 %1052  ;;  %949 = vmatprep.subr.bf16.mxu0 %v948_v26  ;;  %v455_v49 = vsel %vm453_vm10, %v1064_v37, %v1065_v14  ;;  %v454_v13 = vsel %vm453_vm10, %v1039_v17, %v1064_v37  ;;  %v548_v26 = vld [vmem:[%s1325_s1 + $0x28] sm:$0xff] }
 0x10f   : > { %v1055_v34 = vunpack.i.h.bf16 %v1053_v31  ;;  %v1054_v35 = vunpack.i.l.bf16 %v1053_v31  ;;  %v1068_v36 = vpop.permute.xlu0 %1067 }
 0x110   : > { %v1070_v38 = vunpack.i.h.bf16 %v1068_v36  ;;  %v1069_v39 = vunpack.i.l.bf16 %v1068_v36 }
 0x111   : > { %951 = vmatpush1.bf16.msra.mxu0 %v950_v32  ;;  %v403_v40 = vsel %vm401_vm9, %v1054_v35, %v1055_v34  ;;  %v402_v16 = vsel %vm401_vm9, %v1019_v33, %v1054_v35 }
 0x112   : > { %v1073_v41 = vpop.permute.xlu1 %1072  ;;  %v952_v42 = vpack.c.bf16 %v405_v10, %v403_v40  ;;  %v954_v43 = vpack.c.bf16 %v404_v11, %v402_v16  ;;  %v488_v51 = vsel %vm484_vm11, %v1069_v39, %v1070_v38  ;;  %v1117_v10 = vmov 0.0  }
 0x113   : > { %v1075_v46 = vunpack.i.h.bf16 %v1073_v41  ;;  %v1074_v47 = vunpack.i.l.bf16 %v1073_v41  ;;  %v1083_v48 = vpop.permute.xlu0 %1082  ;;  %v960_v59 = vpack.c.bf16 %v488_v51, %v486_v57 }
 0x114   : > { %953 = vmatprep.subr.bf16.mxu0 %v952_v42  ;;  %v1085_v58 = vunpack.i.h.bf16 %v1083_v48  ;;  %v1084_v60 = vunpack.i.l.bf16 %v1083_v48 }
 0x115   : > { %955 = vmatpush1.bf16.msra.mxu0 %v954_v43  ;;  %v457_v12 = vsel %vm453_vm10, %v1074_v47, %v1075_v46  ;;  %v456_v50 = vsel %vm453_vm10, %v1040_v15, %v1074_v47 }
 0x116   : > { %v1078_v18 = vpop.permute.xlu1 %1077  ;;  %v956_v52 = vpack.c.bf16 %v457_v12, %v455_v49  ;;  %v958_v53 = vpack.c.bf16 %v456_v50, %v454_v13  ;;  %v532_v5 = vsel %vm530_vm12, %v1084_v60, %v1085_v58 }
 0x117   : > { %v1080_v54 = vunpack.i.h.bf16 %v1078_v18  ;;  %v1079_v55 = vunpack.i.l.bf16 %v1078_v18  ;;  %v1093_v56 = vpop.permute.xlu0 %1092 }
 0x118   : > { %957 = vmatprep.subr.bf16.mxu0 %v956_v52  ;;  %v1094_v61 = vunpack.i.l.bf16 %v1093_v56  ;;  %v1095_v2 = vunpack.i.h.bf16 %v1093_v56 }
 0x119   : > { %959 = vmatpush1.bf16.msra.mxu0 %v958_v53  ;;  %v485_v62 = vsel %vm484_vm11, %v1079_v55, %v1049_v45  ;;  %v487_v63 = vsel %vm484_vm11, %v1080_v54, %v1069_v39 }
 0x11a   : > { %v1088_v0 = vpop.permute.xlu1 %1087  ;;  %961 = vmatprep.subr.bf16.mxu0 %v960_v59  ;;  %v962_v1 = vpack.c.bf16 %v487_v63, %v485_v62  ;;  %v531_v9 = vsel %vm530_vm12, %v1094_v61, %v1084_v60 }
 0x11b   : > { %v1090_v3 = vunpack.i.h.bf16 %v1088_v0  ;;  %v1089_v4 = vunpack.i.l.bf16 %v1088_v0 }
 0x11d   : > { %963 = vmatpush1.bf16.msra.mxu0 %v962_v1  ;;  %v534_v8 = vsel %vm530_vm12, %v1089_v4, %v1090_v3  ;;  %v533_v19 = vsel %vm530_vm12, %v1095_v2, %v1089_v4 }
 0x11e   : > { %v964_v20 = vpack.c.bf16 %v534_v8, %v532_v5  ;;  %v966_v21 = vpack.c.bf16 %v533_v19, %v531_v9 }
 0x120   : > { %965 = vmatprep.subr.bf16.mxu0 %v964_v20 }
 0x121   : > { %967 = vmatpush1.bf16.msra.mxu0 %v966_v21 }
 0x124   : > { %664 = vmatmul.mubr.f32.vlgmr.msra.gmra.mrb[0].mxu0 %v543_v22 }
 0x125   : > { %924 = vmatprep.mubr.msk.f32.mxu0 %vm295_vm1, %v546_v23 }
 0x128   : > { %670 = vmatmul.mubr.f32.gmra.mrb[2].mxu0 %v545_v25 }
 0x129   : > { %925 = vmatprep.mubr.msk.f32.mxu0 %vm295_vm1, %v548_v26 }
 0x12c   : > { %676 = vmatmul.mubr.f32.gmra.mrb[4].mxu0 %v547_v28 }
 0x12d   : > { %926 = vmatprep.mubr.msk.f32.mxu0 %vm295_vm1, %v550_v29 }
 0x130   : > { %682 = vmatmul.mubr.f32.gmra.mrb[6].mxu0 %v549_v30 }
 0x1f7   : > { %v665_v31 = vpop.f32.mrb[0].mxu0 }
 0x1f8   : > { %v667_v32 = vpop.f32.mrb[1].mxu0 }
 0x1fb   : > { %v671_v33 = vpop.f32.mrb[2].mxu0 }
 0x1fc   : > { %v673_v34 = vpop.f32.mrb[3].mxu0 }
 0x1fd   : > { %688 = vmatprep.subr.mxu1 %v673_v34 }
 0x1fe   : > { %689 = vmatpush1.xpose.msra.mxu1 %v671_v33 }
 0x1ff   : > { %v677_v35 = vpop.f32.mrb[4].mxu0  ;;  %770 = vmatprep.subr.mxu1 %v667_v32 }
 0x200   : > { %v679_v36 = vpop.f32.mrb[5].mxu0 }
 0x201   : > { %752 = vmatprep.mubr.f32.mxu1 %v679_v36 }
 0x202   : > { %753 = vmatmul.mubr.f32.vlgmr.msra.gmra.mrb[0].mxu1 %v677_v35 }
 0x203   : > { %771 = vmatpush1.msra.mxu1 %v665_v31  ;;  %v683_v14 = vpop.f32.mrb[6].mxu0 }
 0x204   : > { %v685_v37 = vpop.f32.mrb[7].mxu0 }
 0x205   : > { %757 = vmatprep.mubr.f32.mxu1 %v685_v37 }
 0x206   : > { %758 = vmatmul.mubr.f32.gmra.mrb[2].mxu1 %v683_v14 }
 0x207   : > { %834 = vmatprep.mubr.f32.mxu1 %v1117_v10 }
 0x2d5   : > { %v754_v11 = vpop.f32.mrb[0].mxu1 }
 0x2d6   : > { %v756_v38 = vpop.f32.mrb[1].mxu1  ;;  %927 = vmatmul.mubr.msk.f32.vlgmr.msra.gmra.mrb[4].mxu1 %vm763_vm13, %v754_v11 }
 0x2d7   : > { %840 = vmatprep.mubr.f32.mxu1 %v1117_v10 }
 0x2d9   : > { %v759_v39 = vpop.f32.mrb[2].mxu1 }
 0x2da   : > { %v761_v40 = vpop.f32.mrb[3].mxu1  ;;  %928 = vmatmul.mubr.msk.f32.gmra.mrb[6].mxu1 %vm763_vm13, %v759_v39 }
 0x3a9   : > { %v836_v16 = vpop.f32.mrb[4].mxu1 }
 0x3aa   : > { %v851_v15 = vadd.f32 %v836_v16, %v1262_v24  ;;  %v838_v17 = vpop.f32.mrb[5].mxu1 }
 0x3ab   : > { %v852_v41 = vadd.f32 %v838_v17, %v1254_v6 }
 0x3ac   : > { %855 = vst [vmem:[%s170_s29] sm:$0xff] %v851_v15 }
 0x3ad   : > { %856 = vst [vmem:[%s170_s29 + $0x8] sm:$0xff] %v852_v41  ;;  %v842_v42 = vpop.f32.mrb[6].mxu1 }
 0x3ae   : > { %v853_v43 = vadd.f32 %v842_v42, %v1267_v27  ;;  %v844_v44 = vpop.f32.mrb[7].mxu1 }
 0x3af   : > { %v854_v45 = vadd.f32 %v844_v44, %v1257_v7 }
 0x3b0   : > { %857 = vst [vmem:[%s170_s29 + $0x10] sm:$0xff] %v853_v43 }
 0x3b1   : > { %858 = vst [vmem:[%s170_s29 + $0x18] sm:$0xff] %v854_v45 }
 0x3b2 PF: > { %s13_s12 = sadd.s32 1, %s1102_s12  }
 0x3b3   : > { %p10_p4 = scmp.ge.s32.totalorder %s13_s12, 4  }
 0x3b5   :  { %12 = sbr.rel (!%p10_p4) target bundleno = 1 (0x1), region = 63 }

</bundles_post_ra>
